<compile_context>
chip_gen: v6e
topology: v6e:2x2x1
jax: 0.10.0
libtpu: 0.0.40
codegen_flags: <defaults>
</compile_context>

<pallas_src>
import jax
import jax.numpy as jnp
from jax.experimental import pallas as pl
from jax.experimental.pallas import tpu as pltpu


_PALLAS_MIN_BATCH = 256   # below this, plain XLA fusion wins (launch overhead)
_TM_MAX = 1024            # batch tile rows; ~1 MiB f32/step, trivial vs 32-64 MiB VMEM


def _round_up(x, m):
    return (x + m - 1) // m * m


def mlp_kernel(x_ref, w1_ref, b1_ref, w2_ref, b2_ref, w3_ref, b3_ref, o_ref):
    """Fused 3-layer MLP on one (tm, d_in) batch tile.

    x arrives as f32 straight from HBM and is cast to bf16 on the VPU (lots of
    slack) so the input stream is a single f32 read.  Weights are bf16 and
    VMEM-resident across grid steps; matmuls accumulate in f32; bias add and
    ReLU stay f32 (v5e VPU has no bf16 ALU).
    """
    x = x_ref[...].astype(jnp.bfloat16)                                # (tm, d_in)
    h = jnp.dot(x, w1_ref[...], preferred_element_type=jnp.float32) + b1_ref[...]
    h = jnp.maximum(h, 0.0)                                            # ReLU (f32)
    h = jnp.dot(h.astype(jnp.bfloat16), w2_ref[...],
                preferred_element_type=jnp.float32) + b2_ref[...]
    h = jnp.maximum(h, 0.0)
    y = jnp.dot(h.astype(jnp.bfloat16), w3_ref[...],
                preferred_element_type=jnp.float32) + b3_ref[...]
    o_ref[...] = y.astype(o_ref.dtype)                                 # (tm, d_out)


def prepare_params(params):
    """One-time param prep (hoisted out of the forward path).

    Weights -> bf16 (MXU-native streaming dtype), biases -> f32 (1, out) rows.
    """
    return tuple(
        (jnp.asarray(w, jnp.bfloat16), jnp.asarray(b, jnp.float32).reshape(1, -1))
        for (w, b) in params
    )


def _reference_forward_f32(x2d, raw_params):
    (w1, b1), (w2, b2), (w3, b3) = raw_params
    h = jnp.maximum(x2d @ w1 + b1, 0.0)
    h = jnp.maximum(h @ w2 + b2, 0.0)
    return h @ w3 + b3


def _mlp_bf16(x2d, prepped):
    """Same math as the kernel (bf16 operands, f32 accumulation / epilogue)."""
    (w1, b1), (w2, b2), (w3, b3) = prepped
    h = jnp.dot(x2d.astype(jnp.bfloat16), w1,
                preferred_element_type=jnp.float32) + b1
    h = jnp.maximum(h, 0.0)
    h = jnp.dot(h.astype(jnp.bfloat16), w2,
                preferred_element_type=jnp.float32) + b2
    h = jnp.maximum(h, 0.0)
    return jnp.dot(h.astype(jnp.bfloat16), w3,
                   preferred_element_type=jnp.float32) + b3


def custom_nn_forward(x, prepped_params, *, force_pallas=False):
    """CustomNN forward: x.view(B, -1) -> Linear/ReLU/Linear/ReLU/Linear.

    `prepped_params` comes from prepare_params().
    """
    B = x.shape[0]
    x2d = x.reshape(B, -1)                   # flatten only; no dtype copy in wrapper
    (w1, b1), (w2, b2), (w3, b3) = prepped_params
    d_in = x2d.shape[1]
    h1, h2, d_out = w1.shape[1], w2.shape[1], w3.shape[1]

    # Tiny batches: pallas_call is pure launch overhead — let XLA fuse it.
    if B < _PALLAS_MIN_BATCH and not force_pallas:
        return _mlp_bf16(x2d, prepped_params)

    # Degenerate tiny forced batches: pad rows to one sublane granule (<= 7 extra
    # rows).  Normal batches are never padded — the ragged tail block is handled
    # by Pallas (padded rows compute garbage that is masked out of the output).
    n_rows, padded = B, False
    if B < 8:
        x2d = jnp.zeros((8, d_in), x2d.dtype).at[:B].set(x2d)
        n_rows, padded = 8, True

    # Batch tile: as large as possible, but capped at ceil(B/2) so the grid stays
    # >= 2 and ("parallel",) actually shards the batch over both v7x TensorCores.
    tm = max(8, min(_TM_MAX, _round_up(pl.cdiv(n_rows, 2), 8)))
    num_blocks = pl.cdiv(n_rows, tm)

    # Deeper pipelining on the dominant (input) stream only pays off once the
    # grid is long enough; the output stream is ~12x smaller so default depth
    # is kept there.
    x_pipeline = pl.Buffered(3) if num_blocks >= 3 else None

    def resident(arr):   # whole array, same block every grid step -> stays in VMEM
        return pl.BlockSpec(arr.shape, lambda i: (0, 0))

    cost = pl.CostEstimate(
        flops=2 * n_rows * (d_in * h1 + h1 * h2 + h2 * d_out),
        transcendentals=0,
        bytes_accessed=(x2d.size * x2d.dtype.itemsize            # f32 input read
                        + n_rows * d_out * 4                     # f32 output write
                        + 2 * (w1.size + w2.size + w3.size)      # bf16 weights
                        + 4 * (b1.size + b2.size + b3.size)),    # f32 biases
    )

    out = pl.pallas_call(
        mlp_kernel,
        out_shape=jax.ShapeDtypeStruct((n_rows, d_out), jnp.float32),
        grid_spec=pltpu.PrefetchScalarGridSpec(
            num_scalar_prefetch=0,
            grid=(num_blocks,),
            in_specs=[
                pl.BlockSpec((tm, d_in), lambda i: (i, 0),
                             pipeline_mode=x_pipeline),          # x: tiled over batch
                resident(w1), resident(b1),
                resident(w2), resident(b2),
                resident(w3), resident(b3),
            ],
            out_specs=pl.BlockSpec((tm, d_out), lambda i: (i, 0)),
        ),
        compiler_params=pltpu.CompilerParams(
            dimension_semantics=("parallel",),                   # megacore on v7x
        ),
        cost_estimate=cost,
    )(x2d, w1, b1, w2, b2, w3, b3)

    return out[:B] if padded else out


def init_linear(key, fan_in, fan_out):
    """Deterministic init mimicking nn.Linear default U(-1/sqrt(in), 1/sqrt(in)).

    Weight is stored pre-transposed to (in, out); bias as a (1, out) row.
    """
    kw, kb = jax.random.split(key)
    bound = 1.0 / jnp.sqrt(jnp.float32(fan_in))
    w = jax.random.uniform(kw, (fan_in, fan_out), jnp.float32, -bound, bound)
    b = jax.random.uniform(kb, (1, fan_out), jnp.float32, -bound, bound)
    return w, b


if __name__ == "__main__":
    # CustomNN(layer_sizes=[256, 64, 32, 10], activation_func=nn.ReLU())
    layer_sizes = [256, 64, 32, 10]

    key = jax.random.PRNGKey(0)
    kx, kxl, kxr, k1, k2, k3 = jax.random.split(key, 6)

    raw_params = (
        init_linear(k1, layer_sizes[0], layer_sizes[1]),
        init_linear(k2, layer_sizes[1], layer_sizes[2]),
        init_linear(k3, layer_sizes[2], layer_sizes[3]),
    )
    params = prepare_params(raw_params)       # one-time bf16/f32 prep (hoisted)

    # --- small case: (batch=2, C=1, H=16, W=16) -> 256 features (force kernel) ---
    x_small = jax.random.normal(kx, (2, 1, 16, 16), jnp.float32)
    out_small = jax.block_until_ready(
        custom_nn_forward(x_small, params, force_pallas=True))
    assert out_small.shape == (2, 10)
    x2d_small = x_small.reshape(2, -1)
    ref_bf16 = _mlp_bf16(x2d_small, params)
    ref_f32 = _reference_forward_f32(x2d_small, raw_params)
    assert jnp.allclose(out_small, ref_bf16, atol=1e-3, rtol=1e-3)
    assert jnp.allclose(out_small, ref_f32, atol=5e-2, rtol=5e-2)

    # --- evenly tiled batch: grid = 2, both TensorCores participate on v7x ---
    x_even = jax.random.normal(kxl, (1024, 256), jnp.float32)
    out_even = jax.block_until_ready(custom_nn_forward(x_even, params))
    assert out_even.shape == (1024, 10)
    assert jnp.allclose(out_even, _mlp_bf16(x_even.reshape(1024, -1), params),
                        atol=1e-3, rtol=1e-3)

    # --- ragged batch (B % tm != 0): no host-side pad copy, masked tail block ---
    x_rag = jax.random.normal(kxr, (1000, 256), jnp.float32)
    out_rag = jax.block_until_ready(custom_nn_forward(x_rag, params))
    assert out_rag.shape == (1000, 10)
    assert jnp.allclose(out_rag, _mlp_bf16(x_rag.reshape(1000, -1), params),
                        atol=1e-3, rtol=1e-3)

    # --- long grid (>= 3 steps): exercises pl.Buffered(3) deeper pipelining ---
    x_big = jax.random.normal(kx, (4096, 256), jnp.float32)
    out_big = jax.block_until_ready(custom_nn_forward(x_big, params))
    assert out_big.shape == (4096, 10)
    assert jnp.allclose(out_big, _mlp_bf16(x_big.reshape(4096, -1), params),
                        atol=1e-3, rtol=1e-3)

    print("KERNEL_OK")
</pallas_src>

<mosaic_0001>
module attributes {stable_mosaic.version = 11 : i64} {
  func.func @mlp_kernel(%arg0: i32, %arg1: memref<8x256xf32, #tpu.memory_space<vmem>>, %arg2: memref<256x64xbf16, #tpu.memory_space<vmem>>, %arg3: memref<1x64xf32, #tpu.memory_space<vmem>>, %arg4: memref<64x32xbf16, #tpu.memory_space<vmem>>, %arg5: memref<1x32xf32, #tpu.memory_space<vmem>>, %arg6: memref<32x10xbf16, #tpu.memory_space<vmem>>, %arg7: memref<1x10xf32, #tpu.memory_space<vmem>>, %arg8: memref<8x10xf32, #tpu.memory_space<vmem>>) attributes {dimension_semantics = [#tpu.dimension_semantics<parallel>], iteration_bounds = array<i64: 1>, scalar_prefetch = 0 : i64, scratch_operands = 0 : i64, tpu.core_type = #tpu.core_type<tc>, window_params = [{transform_indices = @transform_0, window_bounds = array<i64: 8, 256>}, {pipeline_mode = #tpu.pipeline_mode<synchronous>, transform_indices = @transform_1, window_bounds = array<i64: 256, 64>}, {pipeline_mode = #tpu.pipeline_mode<synchronous>, transform_indices = @transform_2, window_bounds = array<i64: 1, 64>}, {pipeline_mode = #tpu.pipeline_mode<synchronous>, transform_indices = @transform_3, window_bounds = array<i64: 64, 32>}, {pipeline_mode = #tpu.pipeline_mode<synchronous>, transform_indices = @transform_4, window_bounds = array<i64: 1, 32>}, {pipeline_mode = #tpu.pipeline_mode<synchronous>, transform_indices = @transform_5, window_bounds = array<i64: 32, 10>}, {pipeline_mode = #tpu.pipeline_mode<synchronous>, transform_indices = @transform_6, window_bounds = array<i64: 1, 10>}, {transform_indices = @transform_7, window_bounds = array<i64: 8, 10>}]} {
    %c0 = arith.constant 0 : index
    %c0_0 = arith.constant 0 : index
    %0 = vector.load %arg1[%c0, %c0_0] : memref<8x256xf32, #tpu.memory_space<vmem>>, vector<8x256xf32>
    %1 = arith.truncf %0 : vector<8x256xf32> to vector<8x256xbf16>
    %c0_1 = arith.constant 0 : index
    %c0_2 = arith.constant 0 : index
    %2 = vector.load %arg2[%c0_1, %c0_2] : memref<256x64xbf16, #tpu.memory_space<vmem>>, vector<256x64xbf16>
    %cst = arith.constant dense<0.000000e+00> : vector<8x64xf32>
    %3 = tpu.matmul %1, %2, %cst {dimension_numbers = #tpu.dot_dimension_numbers<[1], [0], [0], [1], [0, 0, 1, 1], [], []>} : vector<8x256xbf16>, vector<256x64xbf16>, vector<8x64xf32> -> vector<8x64xf32>
    %c0_3 = arith.constant 0 : index
    %c0_4 = arith.constant 0 : index
    %4 = vector.load %arg3[%c0_3, %c0_4] : memref<1x64xf32, #tpu.memory_space<vmem>>, vector<1x64xf32>
    %5 = vector.broadcast %4 : vector<1x64xf32> to vector<8x64xf32>
    %6 = arith.addf %3, %5 : vector<8x64xf32>
    %cst_5 = arith.constant 0.000000e+00 : f32
    %7 = vector.broadcast %cst_5 : f32 to vector<8x64xf32>
    %8 = arith.maximumf %6, %7 : vector<8x64xf32>
    %9 = arith.truncf %8 : vector<8x64xf32> to vector<8x64xbf16>
    %c0_6 = arith.constant 0 : index
    %c0_7 = arith.constant 0 : index
    %10 = vector.load %arg4[%c0_6, %c0_7] : memref<64x32xbf16, #tpu.memory_space<vmem>>, vector<64x32xbf16>
    %cst_8 = arith.constant dense<0.000000e+00> : vector<8x32xf32>
    %11 = tpu.matmul %9, %10, %cst_8 {dimension_numbers = #tpu.dot_dimension_numbers<[1], [0], [0], [1], [0, 0, 1, 1], [], []>} : vector<8x64xbf16>, vector<64x32xbf16>, vector<8x32xf32> -> vector<8x32xf32>
    %c0_9 = arith.constant 0 : index
    %c0_10 = arith.constant 0 : index
    %12 = vector.load %arg5[%c0_9, %c0_10] : memref<1x32xf32, #tpu.memory_space<vmem>>, vector<1x32xf32>
    %13 = vector.broadcast %12 : vector<1x32xf32> to vector<8x32xf32>
    %14 = arith.addf %11, %13 : vector<8x32xf32>
    %cst_11 = arith.constant 0.000000e+00 : f32
    %15 = vector.broadcast %cst_11 : f32 to vector<8x32xf32>
    %16 = arith.maximumf %14, %15 : vector<8x32xf32>
    %17 = arith.truncf %16 : vector<8x32xf32> to vector<8x32xbf16>
    %c0_12 = arith.constant 0 : index
    %c0_13 = arith.constant 0 : index
    %18 = vector.load %arg6[%c0_12, %c0_13] : memref<32x10xbf16, #tpu.memory_space<vmem>>, vector<32x10xbf16>
    %cst_14 = arith.constant dense<0.000000e+00> : vector<8x10xf32>
    %19 = tpu.matmul %17, %18, %cst_14 {dimension_numbers = #tpu.dot_dimension_numbers<[1], [0], [0], [1], [0, 0, 1, 1], [], []>} : vector<8x32xbf16>, vector<32x10xbf16>, vector<8x10xf32> -> vector<8x10xf32>
    %c0_15 = arith.constant 0 : index
    %c0_16 = arith.constant 0 : index
    %20 = vector.load %arg7[%c0_15, %c0_16] : memref<1x10xf32, #tpu.memory_space<vmem>>, vector<1x10xf32>
    %21 = vector.broadcast %20 : vector<1x10xf32> to vector<8x10xf32>
    %22 = arith.addf %19, %21 : vector<8x10xf32>
    %c0_17 = arith.constant 0 : index
    %c0_18 = arith.constant 0 : index
    %23 = vector.load %arg8[%c0_17, %c0_18] : memref<8x10xf32, #tpu.memory_space<vmem>>, vector<8x10xf32>
    tpu.vector_store %arg8[%c0_17, %c0_18], %22 {strides = array<i32>} : memref<8x10xf32, #tpu.memory_space<vmem>>, vector<8x10xf32>,
    return
  }
  func.func @transform_0(%arg0: i32) -> (i32, i32) {
    %c0_i32 = arith.constant 0 : i32
    %c0_i32_0 = arith.constant 0 : i32
    return %arg0, %c0_i32 : i32, i32
  }
  func.func @transform_1(%arg0: i32) -> (i32, i32) {
    %c0_i32 = arith.constant 0 : i32
    %c0_i32_0 = arith.constant 0 : i32
    %c0_i32_1 = arith.constant 0 : i32
    return %c0_i32, %c0_i32_0 : i32, i32
  }
  func.func @transform_2(%arg0: i32) -> (i32, i32) {
    %c0_i32 = arith.constant 0 : i32
    %c0_i32_0 = arith.constant 0 : i32
    %c0_i32_1 = arith.constant 0 : i32
    return %c0_i32, %c0_i32_0 : i32, i32
  }
  func.func @transform_3(%arg0: i32) -> (i32, i32) {
    %c0_i32 = arith.constant 0 : i32
    %c0_i32_0 = arith.constant 0 : i32
    %c0_i32_1 = arith.constant 0 : i32
    return %c0_i32, %c0_i32_0 : i32, i32
  }
  func.func @transform_4(%arg0: i32) -> (i32, i32) {
    %c0_i32 = arith.constant 0 : i32
    %c0_i32_0 = arith.constant 0 : i32
    %c0_i32_1 = arith.constant 0 : i32
    return %c0_i32, %c0_i32_0 : i32, i32
  }
  func.func @transform_5(%arg0: i32) -> (i32, i32) {
    %c0_i32 = arith.constant 0 : i32
    %c0_i32_0 = arith.constant 0 : i32
    %c0_i32_1 = arith.constant 0 : i32
    return %c0_i32, %c0_i32_0 : i32, i32
  }
  func.func @transform_6(%arg0: i32) -> (i32, i32) {
    %c0_i32 = arith.constant 0 : i32
    %c0_i32_0 = arith.constant 0 : i32
    %c0_i32_1 = arith.constant 0 : i32
    return %c0_i32, %c0_i32_0 : i32, i32
  }
  func.func @transform_7(%arg0: i32) -> (i32, i32) {
    %c0_i32 = arith.constant 0 : i32
    %c0_i32_0 = arith.constant 0 : i32
    return %arg0, %c0_i32 : i32, i32
  }
}

</mosaic_0001>

<bundles_post_ra>
// kernel: tpu_custom_call.1
= control target key start
LH: loop header
LB: loop body
LE: loop exit
PB: predicated region body
PF: predicated region fallthrough
CT: control target
= control target key end

     0   :  { %v501_v2 = vmov 0.0   ;;  %s636_s0 = inlined_call_operand.vmem [shape: f32[8,256], index: 0, kind: input, shape index: {}]   ;;  %s637_s1 = inlined_call_operand.vmem [shape: bf16[256,64], index: 1, kind: input, shape index: {}]   ;;  %s638_s2 = inlined_call_operand.vmem [shape: f32[1,64], index: 2, kind: input, shape index: {}]   ;;  %s639_s3 = inlined_call_operand.vmem [shape: bf16[64,32], index: 3, kind: input, shape index: {}]   ;;  %s640_s4 = inlined_call_operand.vmem [shape: f32[1,32], index: 4, kind: input, shape index: {}]   ;;  %s641_s5 = inlined_call_operand.vmem [shape: bf16[32,10], index: 5, kind: input, shape index: {}]   ;;  %s642_s6 = inlined_call_operand.vmem [shape: f32[1,10], index: 6, kind: input, shape index: {}]   ;;  %s643_s7 = inlined_call_operand.hbm [shape: f32[8,10], index: 7, kind: output, shape index: {}]  }
   0x1   :  { %v457_v0 = vld [vmem:[%s637_s1 + $0x78] sm:$0xff]   ;;  %434 = vmatprep.subr.bf16.mxu1 %v501_v2  ;;  %v459_v3 = vld [vmem:[%s637_s1 + $0x70] sm:$0xff]   ;;  %v461_v5 = vld [vmem:[%s637_s1 + $0x68] sm:$0xff]  }
   0x2   :  { %v458_v1 = vld [vmem:[%s637_s1 + $0x38] sm:$0xff]   ;;  %404 = vmatprep.subr.bf16.mxu0 %v457_v0  ;;  %v460_v4 = vld [vmem:[%s637_s1 + $0x30] sm:$0xff]   ;;  %v462_v6 = vld [vmem:[%s637_s1 + $0x28] sm:$0xff]  }
   0x3   :  { %405 = vmatpush3.bf16.msra.mxu0 %v458_v1  ;;  %v463_v7 = vld [vmem:[%s637_s1 + $0x60] sm:$0xff]   ;;  %v465_v9 = vld [vmem:[%s637_s1 + $0x58] sm:$0xff]   ;;  %v467_v11 = vld [vmem:[%s637_s1 + $0x50] sm:$0xff]  }
   0x4   :  { %406 = vmatprep.subr.bf16.mxu0 %v459_v3  ;;  %v464_v8 = vld [vmem:[%s637_s1 + $0x20] sm:$0xff]   ;;  %v466_v10 = vld [vmem:[%s637_s1 + $0x18] sm:$0xff]   ;;  %v29_v12 = vld [vmem:[%s636_s0 + $0x8] sm:$0xff] }
   0x5   :  { %v468_v13 = vld [vmem:[%s637_s1 + $0x10] sm:$0xff]   ;;  %v31_v14 = vpack.c.bf16 %v29_v12, %v29_v12  ;;  %v473_v15 = vld [vmem:[%s639_s3 + $0x18] sm:$0xff]   ;;  %v469_v16 = vld [vmem:[%s637_s1 + $0x48] sm:$0xff]  }
   0x6   :  { %435 = vmatpush3.bf16.msra.mxu1 %v473_v15 }
   0x7   :  { %407 = vmatpush3.bf16.msra.mxu0 %v460_v4  ;;  %199 = vmatprep.mubr.bf16.mxu0 %v31_v14 }
   0x8   :  { %408 = vmatprep.subr.bf16.mxu0 %v461_v5  ;;  %436 = vmatprep.subr.bf16.mxu1 %v501_v2 }
   0xb   :  { %409 = vmatpush3.bf16.msra.mxu0 %v462_v6 }
   0xc   :  { %410 = vmatprep.subr.bf16.mxu0 %v463_v7 }
   0xf   :  { %411 = vmatpush3.bf16.msra.mxu0 %v464_v8 }
  0x10   :  { %412 = vmatprep.subr.bf16.mxu0 %v465_v9 }
  0x13   :  { %413 = vmatpush3.bf16.msra.mxu0 %v466_v10 }
  0x14   :  { %414 = vmatprep.subr.bf16.mxu0 %v467_v11 }
  0x15   :  { %12 = vsyncpa [#allocation3], 0  ;;  %v470_v17 = vld [vmem:[%s637_s1 + $0x8] sm:$0xff]   ;;  %v471_v18 = vld [vmem:[%s637_s1 + $0x40] sm:$0xff]   ;;  %vm502_vm0 = vmmov 0   ;;  %vm248_vm1 = vcmask 523264  }
  0x16   :  { %v472_v19 = vld [vmem:[%s637_s1] sm:$0xff]   ;;  %v474_v22 = vld [vmem:[%s639_s3 + $0x10] sm:$0xff]   ;;  %v475_v23 = vld [vmem:[%s639_s3 + $0x8] sm:$0xff]   ;;  %442 = vmatprep.mubr.msk.bf16.mxu1 %vm502_vm0, %v501_v2  ;;  %vm317_vm2 = vcmask 261120   ;;  %s503_s28 = smov [#allocation2]   ;;  %vm361_vm3 = vcmask 80896  }
  0x17   :  { %415 = vmatpush3.bf16.msra.mxu0 %v468_v13  ;;  %v28_v20 = vld [vmem:[%s636_s0] sm:$0xff]  ;;  %437 = vmatpush3.bf16.msra.mxu1 %v474_v22  ;;  %v477_v33 = vld [vmem:[%s641_s5 + $0x8] sm:$0xff]  }
  0x18   :  { %416 = vmatprep.subr.bf16.mxu0 %v469_v16  ;;  %v30_v21 = vpack.c.bf16 %v28_v20, %v28_v20  ;;  %438 = vmatprep.subr.bf16.mxu1 %v501_v2  ;;  %v476_v24 = vld [vmem:[%s639_s3] sm:$0xff]  }
  0x19   :  { %v377_v26 = vld [vmem:[%s638_s2] ss:$0 sm:$0xff] }
  0x1a   :  { %v478_v35 = vld [vmem:[%s641_s5] sm:$0xff]   ;;  %s369_s5 = sshll.u32 %s503_s28, 4  ;;  %s370_s5 = int_to_ptr.vmem [resolvable:$true] %s369_s5 }
  0x1b   :  { %417 = vmatpush3.bf16.msra.mxu0 %v470_v17  ;;  %439 = vmatpush3.bf16.msra.mxu1 %v475_v23  ;;  %v394_v36 = vld [vmem:[%s640_s4] ss:$0 sm:$0xff]  ;;  %s479_s4 = scalar_lea.vmem %s370_s5, 128  ;;  %p484_p1 = scmp.lt.s32.totalorder %s370_s5, %s370_s5 }
  0x1c   :  { %418 = vmatprep.subr.bf16.mxu0 %v471_v18  ;;  %440 = vmatprep.subr.bf16.mxu1 %v501_v2  ;;  %v400_v44 = vld [vmem:[%s642_s6] ss:$0 sm:$0xff]  ;;  %p480_p0 = scmp.ne.s32.totalorder %s370_s5, %s479_s4  ;;  %p485_p2 = scmp.lt.s32.totalorder %s479_s4, %s479_s4 }
  0x1e   :  { %p486_p3 = por %p485_p2, %p484_p1 }
  0x1f   :  { %419 = vmatpush3.bf16.msra.mxu0 %v472_v19  ;;  %441 = vmatpush3.bf16.msra.mxu1 %v476_v24 }
  0x20   :  { %446 = vmatprep.subr.bf16.mxu1 %v501_v2  ;;  %p487_p4 = pnand %p486_p3, %p480_p0 }
  0x22   :  { %200 = vmatmul.mubr.bf16.vlgmr.msra.gmra.mxu0 %v30_v21 }
  0xe2   :  { %v420_v25 = vpop.f32.mrf.mxu0 }
  0xe4   :  { %v421_v27 = vpop.f32.mrf.mxu0 }
  0xe5   :  { %v422_v28 = vadd.f32 %v421_v27, %v420_v25 }
  0xe6   :  { %v423_v29 = vpop.f32.mrf.mxu0 }
  0xe7   :  { %v202_v30 = vadd.f32 %v422_v28, %v377_v26 }
  0xe8   :  { %v424_v31 = vpop.f32.mrf.mxu0 }
  0xe9   :  { %v207_v32 = vmax.f32 %v202_v30, 0.0 }
  0xeb   :  { %v208_v34 = vpack.c.bf16 %v207_v32, %v207_v32 }
  0xed   :  { %443 = vmatmul.mubr.msk.bf16.vlgmr.msra.gmra.mxu1 %vm248_vm1, %v208_v34 }
  0xee   :  { %447 = vmatpush3.bf16.msra.mxu1 %v477_v33  ;;  %450 = vmatprep.mubr.msk.bf16.mxu1 %vm502_vm0, %v501_v2 }
  0xef   :  { %448 = vmatprep.subr.bf16.mxu1 %v501_v2 }
  0xf2   :  { %449 = vmatpush3.bf16.msra.mxu1 %v478_v35 }
 0x1ad   :  { %v286_v37 = vpop.f32.mrf.mxu1 }
 0x1ae   :  { %v287_v38 = vadd.f32 %v394_v36, %v286_v37 }
 0x1af   :  { %v444_v39 = vpop.f32.mrf.mxu1 }
 0x1b0   :  { %v292_v40 = vmax.f32 %v287_v38, 0.0 }
 0x1b1   :  { %v289_v41 = vpop.f32.mrf.mxu1 }
 0x1b2   :  { %v293_v42 = vpack.c.bf16 %v292_v40, %v292_v40 }
 0x1b3   :  { %v445_v43 = vpop.f32.mrf.mxu1 }
 0x1b4   :  { %451 = vmatmul.mubr.msk.bf16.vlgmr.msra.gmra.mxu1 %vm317_vm2, %v293_v42 }
 0x274   :  { %v355_v45 = vpop.f32.mrf.mxu1 }
 0x275   :  { %v356_v46 = vadd.f32 %v400_v44, %v355_v45 }
 0x276   :  { %v452_v47 = vpop.f32.mrf.mxu1 }
 0x277   :  { %362 = vst.msk [vmem:[#allocation2] sm:$0xff] %vm361_vm3, %v356_v46 }
 0x278   :  { %v358_v48 = vpop.f32.mrf.mxu1 }
 0x279   :  { %490 = shalt.err (!%p487_p4)
}
 0x27a   :  { %372 = dma.vmem_to_hbm [thread:$0]  %s370_s5, 128, %s643_s7, [#allocation3]   ;;  %v453_v49 = vpop.f32.mrf.mxu1 }
 0x27b   :  { %499 = dma.done.wait [#allocation3], 128  }
 0x27c   :  { %500 = vsyncadd [#allocation3], 4294967168 }
 0x27d   :  { %376 = vsyncpa [#allocation3], 1 }

</bundles_post_ra>
